<compile_context>
chip_gen: v7x
topology: tpu7x:2x2x1
jax: 0.10.0
libtpu: 0.0.40
codegen_flags: <defaults>
</compile_context>

<pallas_src>
import functools

import jax
import jax.numpy as jnp
import numpy as np
from jax.experimental import pallas as pl
from jax.experimental.pallas import tpu as pltpu

HIDDEN = 32
N_LAYERS = 2
INPUT_SIZE = 1
OUTPUT_SIZE = 1
N_VEC_ROWS = 8  # 5 used rows + 3 zero-pad (sublane-aligned packing)


def rnn_kernel(x_ref, h0_ref, w_ref, out_ref, hn_ref):
    """x_ref: (B, T, 1); h0_ref: (2, B, H); w_ref: (3H + 8, H).

    w_ref rows:
      [0:H]        W_hh_l0^T
      [H:2H]       W_ih_l1^T
      [2H:3H]      W_hh_l1^T
      [3H+0]       W_ih_l0^T   (input_size==1 -> a row of H scales)
      [3H+1]       b_ih_l0 + b_hh_l0
      [3H+2]       b_ih_l1 + b_hh_l1
      [3H+3]       fc weight row
      [3H+4]       fc bias (value broadcast across the row)
      [3H+5:3H+8]  zero padding
    """
    B, T, _ = x_ref.shape
    H = w_ref.shape[1]

    w = w_ref[...]                           # (3H + 8, H)
    whh0_t = w[0:H, :]                       # (H, H)  W_hh_l0^T
    wih1_t = w[H:2 * H, :]                   # (H, H)  W_ih_l1^T
    whh1_t = w[2 * H:3 * H, :]               # (H, H)  W_hh_l1^T
    v = w[3 * H:, :]                         # (8, H)  packed row vectors
    wih0 = v[0:1, :].reshape(1, 1, H)        # (1, 1, H)
    b0 = v[1:2, :].reshape(1, 1, H)          # (1, 1, H)
    b1 = v[2:3, :]                           # (1, H)
    fcw = v[3:4, :].reshape(1, 1, H)         # (1, 1, H)
    fcb = v[4:5, 0:1]                        # (1, 1)

    # Layer-0 input contribution for every timestep, hoisted off the serial
    # recurrence chain: (B, T, 1) * (1, 1, H) + (1, 1, H) -> (B, T, H).
    # TODO(synk): chunk this hoist over T once B*T*H*4 approaches ~1/4 of VMEM
    # (v7x has 64 MiB); at B=2, T=8 it is 2 KB and irrelevant.
    pre_in = x_ref[...] * wih0 + b0

    # NOTE: f32 matmuls decompose to multi-pass bf16 on the MXU; if rtol=1e-5
    # ever fails on v7x, add precision=jax.lax.Precision.HIGHEST to the dots.
    def layer1(h1_in, h2_in):
        # Split layer-1: two independent MXU pushes + VPU adds (no lane concat
        # on the recurrence critical path).
        return jnp.tanh(
            jnp.dot(h1_in, wih1_t, preferred_element_type=jnp.float32)
            + jnp.dot(h2_in, whh1_t, preferred_element_type=jnp.float32)
            + b1)

    h1 = h0_ref[0]                           # h1 state, starts at h1(-1)
    h2 = h0_ref[1]                           # h2 state, starts at h2(-1)

    # Staggered, fully unrolled recurrence: iteration t computes h1(t) and
    # h2(t-1); both depend only on state carried in from earlier iterations,
    # so the two chains can be scheduled in parallel.
    h2_steps = []
    for t in range(T):                       # T is static and small
        h1_new = jnp.tanh(
            pre_in[:, t, :]
            + jnp.dot(h1, whh0_t, preferred_element_type=jnp.float32))
        if t > 0:
            h2 = layer1(h1, h2)              # h2(t-1) from h1(t-1), h2(t-2)
            h2_steps.append(h2)
        h1 = h1_new                          # h1(t)
    h2 = layer1(h1, h2)                      # drain: h2(T-1)
    h2_steps.append(h2)

    # Single stacked store of the final hidden state (one store, not two).
    hn_ref[...] = jnp.stack([h1, h2], axis=0)

    # Batched FC head (epilogue, off the recurrence critical path): one
    # elementwise multiply + one lane reduction over all T steps; output is
    # already in PyTorch's (b, t) row order.
    r_out = jnp.stack(h2_steps, axis=1)                       # (B, T, H)
    out_ref[...] = jnp.sum(r_out * fcw, axis=-1) + fcb        # (B, T)


def pack_params(params):
    """One-time packing / transposing of the PyTorch-layout weights into a
    single (3H + 8, H) f32 matrix (one input DMA instead of two)."""
    H = HIDDEN
    mats = jnp.concatenate(
        [params["w_hh_l0"].T, params["w_ih_l1"].T, params["w_hh_l1"].T],
        axis=0)                                               # (3H, H)
    vecs = jnp.concatenate(
        [params["w_ih_l0"].reshape(1, H),
         (params["b_ih_l0"] + params["b_hh_l0"]).reshape(1, H),
         (params["b_ih_l1"] + params["b_hh_l1"]).reshape(1, H),
         params["fc_w"].reshape(1, H),
         jnp.full((1, H), params["fc_b"][0], dtype=jnp.float32),
         jnp.zeros((N_VEC_ROWS - 5, H), dtype=jnp.float32)],
        axis=0)                                               # (8, H)
    return jnp.concatenate([mats, vecs], axis=0).astype(jnp.float32)


def rnn_forward(x, hidden, w_all):
    """x: (B, T, 1) f32 batch_first; hidden: (2, B, H) f32.

    Returns (output (B*T, 1), hn (2, B, H)) matching the PyTorch module."""
    B, T, _ = x.shape
    H = HIDDEN
    vspec = lambda: pl.BlockSpec(memory_space=pltpu.MemorySpace.VMEM)
    out_bt, hn = pl.pallas_call(
        rnn_kernel,
        out_shape=(
            jax.ShapeDtypeStruct((B, T), jnp.float32),
            jax.ShapeDtypeStruct((N_LAYERS, B, H), jnp.float32),
        ),
        in_specs=[vspec(), vspec(), vspec()],
        out_specs=(vspec(), vspec()),
    )(x, hidden, w_all)
    # Row-major flatten of (B, T) == PyTorch's (b, t)-ordered fc(r_out.view(-1,H)).
    output = out_bt.reshape(B * T, OUTPUT_SIZE)
    return output, hn


def rnn_reference(x, hidden, params):
    """Pure-JAX reference matching torch nn.RNN(tanh) + Linear semantics."""
    B, T, _ = x.shape
    h1, h2 = hidden[0], hidden[1]
    outs = []
    for t in range(T):
        x_t = x[:, t, :]
        h1 = jnp.tanh(x_t @ params["w_ih_l0"].T + params["b_ih_l0"]
                      + h1 @ params["w_hh_l0"].T + params["b_hh_l0"])
        h2 = jnp.tanh(h1 @ params["w_ih_l1"].T + params["b_ih_l1"]
                      + h2 @ params["w_hh_l1"].T + params["b_hh_l1"])
        outs.append(h2)
    r_out = jnp.stack(outs, axis=1)                           # (B, T, H)
    out = r_out.reshape(-1, HIDDEN) @ params["fc_w"].T + params["fc_b"]
    hn = jnp.stack([h1, h2], axis=0)
    return out, hn


if __name__ == "__main__":
    B, T = 2, 8
    key = jax.random.PRNGKey(0)
    keys = jax.random.split(key, 12)
    bound = 1.0 / float(np.sqrt(HIDDEN))

    def u(k, shape):
        return jax.random.uniform(k, shape, jnp.float32, -bound, bound)

    params = {
        "w_ih_l0": u(keys[0], (HIDDEN, INPUT_SIZE)),
        "w_hh_l0": u(keys[1], (HIDDEN, HIDDEN)),
        "b_ih_l0": u(keys[2], (HIDDEN,)),
        "b_hh_l0": u(keys[3], (HIDDEN,)),
        "w_ih_l1": u(keys[4], (HIDDEN, HIDDEN)),
        "w_hh_l1": u(keys[5], (HIDDEN, HIDDEN)),
        "b_ih_l1": u(keys[6], (HIDDEN,)),
        "b_hh_l1": u(keys[7], (HIDDEN,)),
        "fc_w": u(keys[8], (OUTPUT_SIZE, HIDDEN)),
        "fc_b": u(keys[9], (OUTPUT_SIZE,)),
    }
    x = jax.random.normal(keys[10], (B, T, INPUT_SIZE), jnp.float32)
    hidden = jax.random.normal(keys[11], (N_LAYERS, B, HIDDEN), jnp.float32)

    # Pack / transpose weights once, outside the jitted call path.
    w_all = pack_params(params)
    fwd = jax.jit(functools.partial(rnn_forward, w_all=w_all))
    out, hn = fwd(x, hidden)
    jax.block_until_ready((out, hn))

    ref_out, ref_hn = rnn_reference(x, hidden, params)
    assert out.shape == (B * T, OUTPUT_SIZE)
    assert hn.shape == (N_LAYERS, B, HIDDEN)
    np.testing.assert_allclose(np.asarray(out), np.asarray(ref_out), rtol=1e-5, atol=1e-5)
    np.testing.assert_allclose(np.asarray(hn), np.asarray(ref_hn), rtol=1e-5, atol=1e-5)
    print("KERNEL_OK")
</pallas_src>

<mosaic_0001>
module attributes {stable_mosaic.version = 11 : i64} {
  func.func @rnn_kernel(%arg0: memref<2x8x1xf32, #tpu.memory_space<vmem>>, %arg1: memref<2x2x32xf32, #tpu.memory_space<vmem>>, %arg2: memref<104x32xf32, #tpu.memory_space<vmem>>, %arg3: memref<2x8xf32, #tpu.memory_space<vmem>>, %arg4: memref<2x2x32xf32, #tpu.memory_space<vmem>>) attributes {dimension_semantics = [], scalar_prefetch = 0 : i64, scratch_operands = 0 : i64, tpu.core_type = #tpu.core_type<tc>} {
    %c0 = arith.constant 0 : index
    %c0_0 = arith.constant 0 : index
    %0 = vector.load %arg2[%c0, %c0_0] : memref<104x32xf32, #tpu.memory_space<vmem>>, vector<104x32xf32>
    %1 = vector.extract_strided_slice %0 {offsets = [0, 0], sizes = [32, 32], strides = [1, 1]} : vector<104x32xf32> to vector<32x32xf32>
    %2 = vector.extract_strided_slice %0 {offsets = [32, 0], sizes = [32, 32], strides = [1, 1]} : vector<104x32xf32> to vector<32x32xf32>
    %3 = vector.extract_strided_slice %0 {offsets = [64, 0], sizes = [32, 32], strides = [1, 1]} : vector<104x32xf32> to vector<32x32xf32>
    %4 = vector.extract_strided_slice %0 {offsets = [96, 0], sizes = [8, 32], strides = [1, 1]} : vector<104x32xf32> to vector<8x32xf32>
    %5 = vector.extract_strided_slice %4 {offsets = [0, 0], sizes = [1, 32], strides = [1, 1]} : vector<8x32xf32> to vector<1x32xf32>
    %6 = vector.shape_cast %5 : vector<1x32xf32> to vector<1x1x32xf32>
    %7 = vector.extract_strided_slice %4 {offsets = [1, 0], sizes = [1, 32], strides = [1, 1]} : vector<8x32xf32> to vector<1x32xf32>
    %8 = vector.shape_cast %7 : vector<1x32xf32> to vector<1x1x32xf32>
    %9 = vector.extract_strided_slice %4 {offsets = [2, 0], sizes = [1, 32], strides = [1, 1]} : vector<8x32xf32> to vector<1x32xf32>
    %10 = vector.extract_strided_slice %4 {offsets = [3, 0], sizes = [1, 32], strides = [1, 1]} : vector<8x32xf32> to vector<1x32xf32>
    %11 = vector.shape_cast %10 : vector<1x32xf32> to vector<1x1x32xf32>
    %12 = vector.extract_strided_slice %4 {offsets = [4, 0], sizes = [1, 1], strides = [1, 1]} : vector<8x32xf32> to vector<1x1xf32>
    %c0_1 = arith.constant 0 : index
    %c0_2 = arith.constant 0 : index
    %c0_3 = arith.constant 0 : index
    %13 = vector.load %arg0[%c0_1, %c0_2, %c0_3] : memref<2x8x1xf32, #tpu.memory_space<vmem>>, vector<2x8x1xf32>
    %14 = vector.broadcast %13 : vector<2x8x1xf32> to vector<2x8x32xf32>
    %15 = vector.broadcast %6 : vector<1x1x32xf32> to vector<2x8x32xf32>
    %16 = arith.mulf %14, %15 : vector<2x8x32xf32>
    %17 = vector.broadcast %8 : vector<1x1x32xf32> to vector<2x8x32xf32>
    %18 = arith.addf %16, %17 : vector<2x8x32xf32>
    %c0_4 = arith.constant 0 : index
    %c0_5 = arith.constant 0 : index
    %c0_6 = arith.constant 0 : index
    %19 = vector.load %arg1[%c0_4, %c0_5, %c0_6] : memref<2x2x32xf32, #tpu.memory_space<vmem>>, vector<1x2x32xf32>
    %20 = vector.shape_cast %19 : vector<1x2x32xf32> to vector<2x32xf32>
    %c1 = arith.constant 1 : index
    %c0_7 = arith.constant 0 : index
    %c0_8 = arith.constant 0 : index
    %21 = vector.load %arg1[%c1, %c0_7, %c0_8] : memref<2x2x32xf32, #tpu.memory_space<vmem>>, vector<1x2x32xf32>
    %22 = vector.shape_cast %21 : vector<1x2x32xf32> to vector<2x32xf32>
    %23 = vector.extract_strided_slice %18 {offsets = [0, 0, 0], sizes = [2, 1, 32], strides = [1, 1, 1]} : vector<2x8x32xf32> to vector<2x1x32xf32>
    %24 = vector.shape_cast %23 : vector<2x1x32xf32> to vector<2x32xf32>
    %cst = arith.constant dense<0.000000e+00> : vector<2x32xf32>
    %25 = tpu.matmul %20, %1, %cst {dimension_numbers = #tpu.dot_dimension_numbers<[1], [0], [0], [1], [0, 0, 1, 1], [], []>} : vector<2x32xf32>, vector<32x32xf32>, vector<2x32xf32> -> vector<2x32xf32>
    %26 = arith.addf %24, %25 : vector<2x32xf32>
    %27 = math.tanh %26 : vector<2x32xf32>
    %28 = vector.extract_strided_slice %18 {offsets = [0, 1, 0], sizes = [2, 1, 32], strides = [1, 1, 1]} : vector<2x8x32xf32> to vector<2x1x32xf32>
    %29 = vector.shape_cast %28 : vector<2x1x32xf32> to vector<2x32xf32>
    %cst_9 = arith.constant dense<0.000000e+00> : vector<2x32xf32>
    %30 = tpu.matmul %27, %1, %cst_9 {dimension_numbers = #tpu.dot_dimension_numbers<[1], [0], [0], [1], [0, 0, 1, 1], [], []>} : vector<2x32xf32>, vector<32x32xf32>, vector<2x32xf32> -> vector<2x32xf32>
    %31 = arith.addf %29, %30 : vector<2x32xf32>
    %32 = math.tanh %31 : vector<2x32xf32>
    %cst_10 = arith.constant dense<0.000000e+00> : vector<2x32xf32>
    %33 = tpu.matmul %27, %2, %cst_10 {dimension_numbers = #tpu.dot_dimension_numbers<[1], [0], [0], [1], [0, 0, 1, 1], [], []>} : vector<2x32xf32>, vector<32x32xf32>, vector<2x32xf32> -> vector<2x32xf32>
    %cst_11 = arith.constant dense<0.000000e+00> : vector<2x32xf32>
    %34 = tpu.matmul %22, %3, %cst_11 {dimension_numbers = #tpu.dot_dimension_numbers<[1], [0], [0], [1], [0, 0, 1, 1], [], []>} : vector<2x32xf32>, vector<32x32xf32>, vector<2x32xf32> -> vector<2x32xf32>
    %35 = arith.addf %33, %34 : vector<2x32xf32>
    %36 = vector.broadcast %9 : vector<1x32xf32> to vector<2x32xf32>
    %37 = arith.addf %35, %36 : vector<2x32xf32>
    %38 = math.tanh %37 : vector<2x32xf32>
    %39 = vector.extract_strided_slice %18 {offsets = [0, 2, 0], sizes = [2, 1, 32], strides = [1, 1, 1]} : vector<2x8x32xf32> to vector<2x1x32xf32>
    %40 = vector.shape_cast %39 : vector<2x1x32xf32> to vector<2x32xf32>
    %cst_12 = arith.constant dense<0.000000e+00> : vector<2x32xf32>
    %41 = tpu.matmul %32, %1, %cst_12 {dimension_numbers = #tpu.dot_dimension_numbers<[1], [0], [0], [1], [0, 0, 1, 1], [], []>} : vector<2x32xf32>, vector<32x32xf32>, vector<2x32xf32> -> vector<2x32xf32>
    %42 = arith.addf %40, %41 : vector<2x32xf32>
    %43 = math.tanh %42 : vector<2x32xf32>
    %cst_13 = arith.constant dense<0.000000e+00> : vector<2x32xf32>
    %44 = tpu.matmul %32, %2, %cst_13 {dimension_numbers = #tpu.dot_dimension_numbers<[1], [0], [0], [1], [0, 0, 1, 1], [], []>} : vector<2x32xf32>, vector<32x32xf32>, vector<2x32xf32> -> vector<2x32xf32>
    %cst_14 = arith.constant dense<0.000000e+00> : vector<2x32xf32>
    %45 = tpu.matmul %38, %3, %cst_14 {dimension_numbers = #tpu.dot_dimension_numbers<[1], [0], [0], [1], [0, 0, 1, 1], [], []>} : vector<2x32xf32>, vector<32x32xf32>, vector<2x32xf32> -> vector<2x32xf32>
    %46 = arith.addf %44, %45 : vector<2x32xf32>
    %47 = vector.broadcast %9 : vector<1x32xf32> to vector<2x32xf32>
    %48 = arith.addf %46, %47 : vector<2x32xf32>
    %49 = math.tanh %48 : vector<2x32xf32>
    %50 = vector.extract_strided_slice %18 {offsets = [0, 3, 0], sizes = [2, 1, 32], strides = [1, 1, 1]} : vector<2x8x32xf32> to vector<2x1x32xf32>
    %51 = vector.shape_cast %50 : vector<2x1x32xf32> to vector<2x32xf32>
    %cst_15 = arith.constant dense<0.000000e+00> : vector<2x32xf32>
    %52 = tpu.matmul %43, %1, %cst_15 {dimension_numbers = #tpu.dot_dimension_numbers<[1], [0], [0], [1], [0, 0, 1, 1], [], []>} : vector<2x32xf32>, vector<32x32xf32>, vector<2x32xf32> -> vector<2x32xf32>
    %53 = arith.addf %51, %52 : vector<2x32xf32>
    %54 = math.tanh %53 : vector<2x32xf32>
    %cst_16 = arith.constant dense<0.000000e+00> : vector<2x32xf32>
    %55 = tpu.matmul %43, %2, %cst_16 {dimension_numbers = #tpu.dot_dimension_numbers<[1], [0], [0], [1], [0, 0, 1, 1], [], []>} : vector<2x32xf32>, vector<32x32xf32>, vector<2x32xf32> -> vector<2x32xf32>
    %cst_17 = arith.constant dense<0.000000e+00> : vector<2x32xf32>
    %56 = tpu.matmul %49, %3, %cst_17 {dimension_numbers = #tpu.dot_dimension_numbers<[1], [0], [0], [1], [0, 0, 1, 1], [], []>} : vector<2x32xf32>, vector<32x32xf32>, vector<2x32xf32> -> vector<2x32xf32>
    %57 = arith.addf %55, %56 : vector<2x32xf32>
    %58 = vector.broadcast %9 : vector<1x32xf32> to vector<2x32xf32>
    %59 = arith.addf %57, %58 : vector<2x32xf32>
    %60 = math.tanh %59 : vector<2x32xf32>
    %61 = vector.extract_strided_slice %18 {offsets = [0, 4, 0], sizes = [2, 1, 32], strides = [1, 1, 1]} : vector<2x8x32xf32> to vector<2x1x32xf32>
    %62 = vector.shape_cast %61 : vector<2x1x32xf32> to vector<2x32xf32>
    %cst_18 = arith.constant dense<0.000000e+00> : vector<2x32xf32>
    %63 = tpu.matmul %54, %1, %cst_18 {dimension_numbers = #tpu.dot_dimension_numbers<[1], [0], [0], [1], [0, 0, 1, 1], [], []>} : vector<2x32xf32>, vector<32x32xf32>, vector<2x32xf32> -> vector<2x32xf32>
    %64 = arith.addf %62, %63 : vector<2x32xf32>
    %65 = math.tanh %64 : vector<2x32xf32>
    %cst_19 = arith.constant dense<0.000000e+00> : vector<2x32xf32>
    %66 = tpu.matmul %54, %2, %cst_19 {dimension_numbers = #tpu.dot_dimension_numbers<[1], [0], [0], [1], [0, 0, 1, 1], [], []>} : vector<2x32xf32>, vector<32x32xf32>, vector<2x32xf32> -> vector<2x32xf32>
    %cst_20 = arith.constant dense<0.000000e+00> : vector<2x32xf32>
    %67 = tpu.matmul %60, %3, %cst_20 {dimension_numbers = #tpu.dot_dimension_numbers<[1], [0], [0], [1], [0, 0, 1, 1], [], []>} : vector<2x32xf32>, vector<32x32xf32>, vector<2x32xf32> -> vector<2x32xf32>
    %68 = arith.addf %66, %67 : vector<2x32xf32>
    %69 = vector.broadcast %9 : vector<1x32xf32> to vector<2x32xf32>
    %70 = arith.addf %68, %69 : vector<2x32xf32>
    %71 = math.tanh %70 : vector<2x32xf32>
    %72 = vector.extract_strided_slice %18 {offsets = [0, 5, 0], sizes = [2, 1, 32], strides = [1, 1, 1]} : vector<2x8x32xf32> to vector<2x1x32xf32>
    %73 = vector.shape_cast %72 : vector<2x1x32xf32> to vector<2x32xf32>
    %cst_21 = arith.constant dense<0.000000e+00> : vector<2x32xf32>
    %74 = tpu.matmul %65, %1, %cst_21 {dimension_numbers = #tpu.dot_dimension_numbers<[1], [0], [0], [1], [0, 0, 1, 1], [], []>} : vector<2x32xf32>, vector<32x32xf32>, vector<2x32xf32> -> vector<2x32xf32>
    %75 = arith.addf %73, %74 : vector<2x32xf32>
    %76 = math.tanh %75 : vector<2x32xf32>
    %cst_22 = arith.constant dense<0.000000e+00> : vector<2x32xf32>
    %77 = tpu.matmul %65, %2, %cst_22 {dimension_numbers = #tpu.dot_dimension_numbers<[1], [0], [0], [1], [0, 0, 1, 1], [], []>} : vector<2x32xf32>, vector<32x32xf32>, vector<2x32xf32> -> vector<2x32xf32>
    %cst_23 = arith.constant dense<0.000000e+00> : vector<2x32xf32>
    %78 = tpu.matmul %71, %3, %cst_23 {dimension_numbers = #tpu.dot_dimension_numbers<[1], [0], [0], [1], [0, 0, 1, 1], [], []>} : vector<2x32xf32>, vector<32x32xf32>, vector<2x32xf32> -> vector<2x32xf32>
    %79 = arith.addf %77, %78 : vector<2x32xf32>
    %80 = vector.broadcast %9 : vector<1x32xf32> to vector<2x32xf32>
    %81 = arith.addf %79, %80 : vector<2x32xf32>
    %82 = math.tanh %81 : vector<2x32xf32>
    %83 = vector.extract_strided_slice %18 {offsets = [0, 6, 0], sizes = [2, 1, 32], strides = [1, 1, 1]} : vector<2x8x32xf32> to vector<2x1x32xf32>
    %84 = vector.shape_cast %83 : vector<2x1x32xf32> to vector<2x32xf32>
    %cst_24 = arith.constant dense<0.000000e+00> : vector<2x32xf32>
    %85 = tpu.matmul %76, %1, %cst_24 {dimension_numbers = #tpu.dot_dimension_numbers<[1], [0], [0], [1], [0, 0, 1, 1], [], []>} : vector<2x32xf32>, vector<32x32xf32>, vector<2x32xf32> -> vector<2x32xf32>
    %86 = arith.addf %84, %85 : vector<2x32xf32>
    %87 = math.tanh %86 : vector<2x32xf32>
    %cst_25 = arith.constant dense<0.000000e+00> : vector<2x32xf32>
    %88 = tpu.matmul %76, %2, %cst_25 {dimension_numbers = #tpu.dot_dimension_numbers<[1], [0], [0], [1], [0, 0, 1, 1], [], []>} : vector<2x32xf32>, vector<32x32xf32>, vector<2x32xf32> -> vector<2x32xf32>
    %cst_26 = arith.constant dense<0.000000e+00> : vector<2x32xf32>
    %89 = tpu.matmul %82, %3, %cst_26 {dimension_numbers = #tpu.dot_dimension_numbers<[1], [0], [0], [1], [0, 0, 1, 1], [], []>} : vector<2x32xf32>, vector<32x32xf32>, vector<2x32xf32> -> vector<2x32xf32>
    %90 = arith.addf %88, %89 : vector<2x32xf32>
    %91 = vector.broadcast %9 : vector<1x32xf32> to vector<2x32xf32>
    %92 = arith.addf %90, %91 : vector<2x32xf32>
    %93 = math.tanh %92 : vector<2x32xf32>
    %94 = vector.extract_strided_slice %18 {offsets = [0, 7, 0], sizes = [2, 1, 32], strides = [1, 1, 1]} : vector<2x8x32xf32> to vector<2x1x32xf32>
    %95 = vector.shape_cast %94 : vector<2x1x32xf32> to vector<2x32xf32>
    %cst_27 = arith.constant dense<0.000000e+00> : vector<2x32xf32>
    %96 = tpu.matmul %87, %1, %cst_27 {dimension_numbers = #tpu.dot_dimension_numbers<[1], [0], [0], [1], [0, 0, 1, 1], [], []>} : vector<2x32xf32>, vector<32x32xf32>, vector<2x32xf32> -> vector<2x32xf32>
    %97 = arith.addf %95, %96 : vector<2x32xf32>
    %98 = math.tanh %97 : vector<2x32xf32>
    %cst_28 = arith.constant dense<0.000000e+00> : vector<2x32xf32>
    %99 = tpu.matmul %87, %2, %cst_28 {dimension_numbers = #tpu.dot_dimension_numbers<[1], [0], [0], [1], [0, 0, 1, 1], [], []>} : vector<2x32xf32>, vector<32x32xf32>, vector<2x32xf32> -> vector<2x32xf32>
    %cst_29 = arith.constant dense<0.000000e+00> : vector<2x32xf32>
    %100 = tpu.matmul %93, %3, %cst_29 {dimension_numbers = #tpu.dot_dimension_numbers<[1], [0], [0], [1], [0, 0, 1, 1], [], []>} : vector<2x32xf32>, vector<32x32xf32>, vector<2x32xf32> -> vector<2x32xf32>
    %101 = arith.addf %99, %100 : vector<2x32xf32>
    %102 = vector.broadcast %9 : vector<1x32xf32> to vector<2x32xf32>
    %103 = arith.addf %101, %102 : vector<2x32xf32>
    %104 = math.tanh %103 : vector<2x32xf32>
    %cst_30 = arith.constant dense<0.000000e+00> : vector<2x32xf32>
    %105 = tpu.matmul %98, %2, %cst_30 {dimension_numbers = #tpu.dot_dimension_numbers<[1], [0], [0], [1], [0, 0, 1, 1], [], []>} : vector<2x32xf32>, vector<32x32xf32>, vector<2x32xf32> -> vector<2x32xf32>
    %cst_31 = arith.constant dense<0.000000e+00> : vector<2x32xf32>
    %106 = tpu.matmul %104, %3, %cst_31 {dimension_numbers = #tpu.dot_dimension_numbers<[1], [0], [0], [1], [0, 0, 1, 1], [], []>} : vector<2x32xf32>, vector<32x32xf32>, vector<2x32xf32> -> vector<2x32xf32>
    %107 = arith.addf %105, %106 : vector<2x32xf32>
    %108 = vector.broadcast %9 : vector<1x32xf32> to vector<2x32xf32>
    %109 = arith.addf %107, %108 : vector<2x32xf32>
    %110 = math.tanh %109 : vector<2x32xf32>
    %111 = vector.shape_cast %98 : vector<2x32xf32> to vector<1x2x32xf32>
    %112 = vector.shape_cast %110 : vector<2x32xf32> to vector<1x2x32xf32>
    %113 = tpu.concatenate %111, %112 in 0 : vector<1x2x32xf32>, vector<1x2x32xf32> -> vector<2x2x32xf32>
    %c0_32 = arith.constant 0 : index
    %c0_33 = arith.constant 0 : index
    %c0_34 = arith.constant 0 : index
    %114 = vector.load %arg4[%c0_32, %c0_33, %c0_34] : memref<2x2x32xf32, #tpu.memory_space<vmem>>, vector<2x2x32xf32>
    tpu.vector_store %arg4[%c0_32, %c0_33, %c0_34], %113 {strides = array<i32>} : memref<2x2x32xf32, #tpu.memory_space<vmem>>, vector<2x2x32xf32>,
    %115 = vector.shape_cast %38 : vector<2x32xf32> to vector<2x1x32xf32>
    %116 = vector.shape_cast %49 : vector<2x32xf32> to vector<2x1x32xf32>
    %117 = vector.shape_cast %60 : vector<2x32xf32> to vector<2x1x32xf32>
    %118 = vector.shape_cast %71 : vector<2x32xf32> to vector<2x1x32xf32>
    %119 = vector.shape_cast %82 : vector<2x32xf32> to vector<2x1x32xf32>
    %120 = vector.shape_cast %93 : vector<2x32xf32> to vector<2x1x32xf32>
    %121 = vector.shape_cast %104 : vector<2x32xf32> to vector<2x1x32xf32>
    %122 = vector.shape_cast %110 : vector<2x32xf32> to vector<2x1x32xf32>
    %123 = tpu.concatenate %115, %116, %117, %118, %119, %120, %121, %122 in 1 : vector<2x1x32xf32>, vector<2x1x32xf32>, vector<2x1x32xf32>, vector<2x1x32xf32>, vector<2x1x32xf32>, vector<2x1x32xf32>, vector<2x1x32xf32>, vector<2x1x32xf32> -> vector<2x8x32xf32>
    %124 = vector.broadcast %11 : vector<1x1x32xf32> to vector<2x8x32xf32>
    %125 = arith.mulf %123, %124 : vector<2x8x32xf32>
    %cst_35 = arith.constant dense<0.000000e+00> : vector<2x8xf32>
    %126 = vector.multi_reduction <add>, %125, %cst_35 [2] : vector<2x8x32xf32> to vector<2x8xf32>
    %127 = vector.broadcast %12 : vector<1x1xf32> to vector<2x8xf32>
    %128 = arith.addf %126, %127 : vector<2x8xf32>
    %c0_36 = arith.constant 0 : index
    %c0_37 = arith.constant 0 : index
    %129 = vector.load %arg3[%c0_36, %c0_37] : memref<2x8xf32, #tpu.memory_space<vmem>>, vector<2x8xf32>
    tpu.vector_store %arg3[%c0_36, %c0_37], %128 {strides = array<i32>} : memref<2x8xf32, #tpu.memory_space<vmem>>, vector<2x8xf32>,
    return
  }
}

</mosaic_0001>

<bundles_post_ra>
// kernel: rnn_forward.1
= control target key start
LH: loop header
LB: loop body
LE: loop exit
PB: predicated region body
PF: predicated region fallthrough
CT: control target
= control target key end

     0   :  { %10 = vsyncpa [#allocation3], 0  ;;  %s3288_s0 = inlined_call_operand.vmem [shape: f32[2,8,1], index: 0, kind: input, shape index: {}]   ;;  %s3289_s1 = inlined_call_operand.vmem [shape: f32[2,2,32], index: 1, kind: input, shape index: {}]   ;;  %s3290_s2 = inlined_call_operand.hbm [shape: f32[104,32], index: 2, kind: input, shape index: {}]   ;;  %s3291_s3 = inlined_call_operand.vmem [shape: f32[2,8], index: 3, kind: output, shape index: {0}]   ;;  %s3292_s4 = inlined_call_operand.hbm [shape: f32[2,2,32], index: 4, kind: output, shape index: {1}]  }
   0x1   :  { %11 = vsyncpa [#allocation4], 0  ;;  %s2928_s15 = smov [#allocation2]   ;;  %s2880_s19 = scalar_lea.hbm %s3290_s2, 1664 }
   0x2   :  { %s21_s16 = sshll.u32 %s2928_s15, 4  ;;  %p2881_p0 = scmp.ne.s32.totalorder %s3290_s2, %s2880_s19  ;;  %s22_s16 = int_to_ptr.vmem [resolvable:$true] %s21_s16 }
   0x3   :  { %p2884_p1 = scmp.lt.u32.totalorder %s2880_s19, %s3290_s2 }
   0x5   :  { %p2886_p2 = pnand %p2884_p1, %p2881_p0 }
   0x7   :  { %2889 = shalt.err (!%p2886_p2)
}
   0x8   :  { %s2890_s24 = scalar_lea.vmem %s22_s16, 1664  ;;  %p2895_p4 = scmp.lt.s32.totalorder %s22_s16, %s22_s16 }
   0x9   :  { %p2891_p3 = scmp.ne.s32.totalorder %s22_s16, %s2890_s24  ;;  %p2896_p5 = scmp.lt.s32.totalorder %s2890_s24, %s2890_s24 }
   0xb   :  { %p2897_p6 = por %p2896_p5, %p2895_p4 }
   0xd   :  { %p2898_p7 = pnand %p2897_p6, %p2891_p3 }
   0xf   :  { %2901 = shalt.err (!%p2898_p7)
}
  0x10   :  { %s2929_s25 = smov 128   ;;  %s2930_s26 = smov 8  }
  0x11   :  { %27 = dma.hbm_to_vmem [thread:$0]  %s3290_s2, 1664, %s22_s16, [#allocation3], %s2929_s25, %s2929_s25, %s2930_s26  }
  0x12   :  { %2924 = dma.done.wait [#allocation3], 1664  }
  0x13   :  { %2925 = vsyncadd [#allocation3], 4294965632  ;;  %v2931_v0 = vmov 0.0|0.0   ;;  %vm2932_vm0 = vmmov 0   ;;  %v2933_v1 = vmov 0.0   ;;  %v2934_v2 = vmov 0  }
  0x14   :  { %2674 = vmatprep.subr.bf16.mxu0 %v2931_v0  ;;  %2418 = vmatprep.mubr.msk.f32.mxu0 %vm2932_vm0, %v2933_v1  ;;  %v31_v3 = vld [vmem:[#allocation2] sm:$0xff]  ;;  %v32_v4 = vld [vmem:[#allocation2 + $0x8] sm:$0xff]  ;;  %v33_v5 = vld [vmem:[#allocation2 + $0x10] sm:$0xff]  ;;  %vm71_vm1 = vcmask 261120   ;;  %v56_v19 = vlaneseq  ;;  %vm156_vm2 = vcmask 1041409   ;;  %vm2187_vm3 = vcmask 1040384  }
  0x15   :  { %2831 = vset.pattern.permute.xlu0 %v2934_v2  ;;  %2680 = vmatprep.subr.bf16.mxu1 %v2931_v0  ;;  %v2982_v6 = vpack.c.bf16 %v32_v4, %v31_v3  ;;  %v34_v7 = vld [vmem:[#allocation2 + $0x18] sm:$0xff]  ;;  %v45_v8 = vld [vmem:[%s3288_s0 + $0x8] sm:$0xff]  ;;  %v44_v10 = vld [vmem:[%s3288_s0] sm:$0xff]  ;;  %vm2190_vm4 = vcmask 1041408   ;;  %vm2193_vm5 = vcmask 1042432   ;;  %vm2196_vm6 = vcmask 1043456  }
  0x16   :  { %2429 = vmatprep.mubr.msk.f32.mxu1 %vm2932_vm0, %v2933_v1  ;;  %53 = vperm.xlu0 %2831, %v45_v8   ;;  %v2988_v9 = vpack.c.bf16 %v34_v7, %v33_v5  ;;  %v68_v11 = vld [vmem:[%s3289_s1] sm:$0x3]  ;;  %v40_v13 = vld [vmem:[#allocation2 + $0x48] sm:$0xff]  ;;  %v41_v15 = vld [vmem:[#allocation2 + $0x50] sm:$0xff]  ;;  %v3025_v20 = vshrl.u32 %v56_v19, 7  ;;  %vm2199_vm7 = vcmask 1044480  }
  0x17   :  { %2676 = vmatpush3.bf16.msra.mxu0 %v2982_v6  ;;  %2682 = vmatpush3.bf16.msra.mxu1 %v2982_v6  ;;  %v39_v12 = vld [vmem:[#allocation2 + $0x40] sm:$0xff]  ;;  %v42_v16 = vld [vmem:[#allocation2 + $0x58] sm:$0xff]  ;;  %v36_v38 = vld [vmem:[#allocation2 + $0x28] sm:$0xff]  ;;  %vm1933_vm8 = vcmask 261127   ;;  %vm1935_vm9 = vcmask 253952   ;;  %vm2202_vm10 = vcmask 1045504  }
  0x18   :  { %2677 = vmatprep.subr.bf16.mxu0 %v2931_v0  ;;  %2683 = vmatprep.subr.bf16.mxu1 %v2931_v0  ;;  %v3006_v14 = vpack.c.bf16 %v40_v13, %v39_v12  ;;  %v3010_v17 = vpack.c.bf16 %v42_v16, %v41_v15  ;;  %v2264_v18 = vld [vmem:[%s3289_s1 + $0x2] sm:$0x3]  ;;  %v3028_v22 = vsub.s32 0, %v3025_v20  ;;  %v64_v24 = vsub.s32 1, %v3025_v20  ;;  %v37_v43 = vld [vmem:[#allocation2 + $0x30] sm:$0xff]  ;;  %v38_v44 = vld [vmem:[#allocation2 + $0x38] sm:$0xff] }
  0x19   :  { %v3030_v23 = vld [vmem:[#allocation2 + $0x60] sm:$0xff]  ;;  %v3047_v46 = vpack.c.bf16 %v38_v44, %v37_v43  ;;  %v383_v52 = vsub.s32 2, %v3025_v20  ;;  %vm2205_vm11 = vcmask 1046528   ;;  %s2936_s1 = smov [#allocation5]  }
  0x1a   :  { %48 = vperm.xlu0 %2831, %v44_v10   ;;  %v59_v25 = vrot.slane %v3030_v23, %v3028_v22  ;;  %v65_v27 = vrot.slane %v3030_v23, %v64_v24  ;;  %v35_v37 = vld [vmem:[#allocation2 + $0x20] sm:$0xff]  ;;  %s2250_s9 = sshll.u32 %s2936_s1, 4  ;;  %s2251_s9 = int_to_ptr.vmem [resolvable:$true] %s2250_s9 }
  0x1b   :  { %2679 = vmatpush3.bf16.msra.mxu0 %v2988_v9  ;;  %2685 = vmatpush3.bf16.msra.mxu1 %v2988_v9  ;;  %v3042_v41 = vpack.c.bf16 %v36_v38, %v35_v37  ;;  %v3065_v55 = vrot.slane %v3030_v23, %v383_v52  ;;  %s2902_s10 = scalar_lea.vmem %s2251_s9, 64  ;;  %p2907_p9 = scmp.lt.s32.totalorder %s2251_s9, %s2251_s9 }
  0x1c   :  { %2686 = vmatprep.subr.bf16.mxu0 %v2931_v0  ;;  %2692 = vmatprep.subr.bf16.mxu1 %v2931_v0  ;;  %p2903_p8 = scmp.ne.s32.totalorder %s2251_s9, %s2902_s10  ;;  %p2908_p10 = scmp.lt.s32.totalorder %s2902_s10, %s2902_s10 }
  0x1e   :  { %2419 = vmatmul.mubr.msk.f32.vlgmr.msra.gmra.mrb[0].mxu0 %vm71_vm1, %v68_v11  ;;  %p2909_p11 = por %p2908_p10, %p2907_p9 }
  0x1f   :  { %2440 = vmatprep.mubr.msk.f32.mxu0 %vm2932_vm0, %v2933_v1  ;;  %2688 = vmatpush3.bf16.msra.mxu0 %v3006_v14 }
  0x20   :  { %2689 = vmatprep.subr.bf16.mxu0 %v2931_v0  ;;  %p2910_p12 = pnand %p2909_p11, %p2903_p8 }
  0x23   :  { %2691 = vmatpush3.bf16.msra.mxu0 %v3010_v17 }
  0x24   :  { %2698 = vmatprep.subr.bf16.mxu0 %v2931_v0 }
  0x26   :  { %2441 = vmatmul.mubr.msk.f32.vlgmr.msra.gmra.mrb[2].mxu0 %vm71_vm1, %v2264_v18  ;;  %v2935_v18 = vmov 1966171168  }
  0x27   :  { %2700 = vmatpush3.bf16.msra.mxu0 %v2982_v6  ;;  %2462 = vmatprep.mubr.msk.f32.mxu0 %vm2932_vm0, %v2933_v1 }
  0x28   :  { %2701 = vmatprep.subr.bf16.mxu0 %v2931_v0 }
  0x2b   :  { %2703 = vmatpush3.bf16.msra.mxu0 %v2988_v9 }
  0x2c   :  { %2710 = vmatprep.subr.bf16.mxu0 %v2931_v0 }
  0x95   :  { %v54_v21 = vpop.permute.xlu0 %53 }
  0x96   :  { %v61_v29 = vmul.f32 %v59_v25, %v54_v21  ;;  %v1940_v21 = vunpack.c.l.s4 %v2935_v18 }
  0x98   :  { %v3038_v32 = vadd.f32 %v65_v27, %v61_v29 }
  0x99   :  { %v49_v26 = vpop.permute.xlu0 %48 }
  0x9a   :  { %v60_v28 = vmul.f32 %v59_v25, %v49_v26  ;;  %v1941_v25 = vunpack.c.0.s8 %v1940_v21 }
  0x9c   :  { %v3036_v30 = vadd.f32 %v65_v27, %v60_v28 }
  0xf1   :  { %v141_v31 = vpop.f32.mrb[0].mxu0 }
  0xf2   :  { %v146_v33 = vrot.slane %v141_v31, 1  ;;  %v2420_v34 = vpop.f32.mrb[1].mxu0  ;;  %v149_v35 = vadd.f32 %v141_v31, %v3036_v30  ;;  %v3094_v31 = vsub.s32 %v1941_v25, %v3025_v20 }
  0xf4   :  { %v150_v36 = vadd.f32 %v146_v33, %v3038_v32 }
  0xf6   :  { %2832 = vtanh.f32 %v150_v36 }
  0xf7   :  { %2834 = vtanh.f32 %v149_v35 }
  0xf9   :  { %v307_v47 = vpop.f32.mrb[2].mxu0 }
  0xfa   :  { %v2442_v48 = vpop.f32.mrb[3].mxu0 }
 0x100   :  { %v2833_v39 = vpop.eup %2832 }
 0x101   :  { %v155_v40 = vrot.slane %v2833_v39, 7  ;;  %v2835_v42 = vpop.eup %2834 }
 0x103   :  { %v157_v45 = vsel %vm156_vm2, %v155_v40, %v2835_v42 }
 0x104   :  { %2430 = vmatmul.mubr.msk.f32.vlgmr.msra.gmra.mrb[0].mxu1 %vm71_vm1, %v157_v45 }
 0x105   :  { %2694 = vmatpush3.bf16.msra.mxu1 %v3042_v41  ;;  %2451 = vmatprep.mubr.msk.f32.mxu1 %vm2932_vm0, %v2933_v1 }
 0x106   :  { %2695 = vmatprep.subr.bf16.mxu1 %v2931_v0 }
 0x109   :  { %2697 = vmatpush3.bf16.msra.mxu1 %v3047_v46 }
 0x10a   :  { %2704 = vmatprep.subr.bf16.mxu1 %v2931_v0 }
 0x10c   :  { %2452 = vmatmul.mubr.msk.f32.vlgmr.msra.gmra.mrb[2].mxu1 %vm71_vm1, %v157_v45 }
 0x10d   :  { %2706 = vmatpush3.bf16.msra.mxu1 %v3006_v14  ;;  %2473 = vmatprep.mubr.msk.f32.mxu1 %vm2932_vm0, %v2933_v1 }
 0x10e   :  { %2707 = vmatprep.subr.bf16.mxu1 %v2931_v0 }
 0x111   :  { %2709 = vmatpush3.bf16.msra.mxu1 %v3010_v17 }
 0x112   :  { %2716 = vmatprep.subr.bf16.mxu1 %v2931_v0 }
 0x1d7   :  { %v226_v49 = vpop.f32.mrb[0].mxu1 }
 0x1d8   :  { %v231_v50 = vrot.slane %v226_v49, 7  ;;  %v2431_v51 = vpop.f32.mrb[1].mxu1  ;;  %v235_v54 = vadd.f32 %v226_v49, %v3038_v32 }
 0x1da   :  { %v234_v53 = vadd.f32 %v231_v50, %v3036_v30 }
 0x1dc   :  { %2836 = vtanh.f32 %v234_v53 }
 0x1dd   :  { %2838 = vtanh.f32 %v235_v54 }
 0x1df   :  { %v377_v56 = vpop.f32.mrb[2].mxu1 }
 0x1e0   :  { %v378_v57 = vadd.f32 %v377_v56, %v307_v47  ;;  %v2453_v58 = vpop.f32.mrb[3].mxu1 }
 0x1e2   :  { %v385_v59 = vadd.f32 %v3065_v55, %v378_v57 }
 0x1e4   :  { %2840 = vtanh.f32 %v385_v59 }
 0x1e6   :  { %v2837_v60 = vpop.eup %2836 }
 0x1e7   :  { %v389_v61 = vrot.slane %v2837_v60, 1  ;;  %v2839_v62 = vpop.eup %2838 }
 0x1e9   :  { %v390_v63 = vsel %vm156_vm2, %v2839_v62, %v389_v61 }
 0x1ea   :  { %2463 = vmatmul.mubr.msk.f32.vlgmr.msra.gmra.mrb[4].mxu0 %vm71_vm1, %v390_v63 }
 0x1eb   :  { %2712 = vmatpush3.bf16.msra.mxu0 %v3042_v41  ;;  %2484 = vmatprep.mubr.msk.f32.mxu0 %vm2932_vm0, %v2933_v1 }
 0x1ec   :  { %2713 = vmatprep.subr.bf16.mxu0 %v2931_v0 }
 0x1ee   :  { %v2841_v2 = vpop.eup %2840 }
 0x1ef   :  { %2474 = vmatmul.mubr.msk.f32.vlgmr.msra.gmra.mrb[4].mxu1 %vm71_vm1, %v2841_v2  ;;  %2715 = vmatpush3.bf16.msra.mxu0 %v3047_v46  ;;  %v1945_v34 = vrot.slane %v2841_v2, %v3094_v31 }
 0x1f0   :  { %2718 = vmatpush3.bf16.msra.mxu1 %v2982_v6  ;;  %2722 = vmatprep.subr.bf16.mxu0 %v2931_v0 }
 0x1f1   :  { %2719 = vmatprep.subr.bf16.mxu1 %v2931_v0  ;;  %2495 = vmatprep.mubr.msk.f32.mxu1 %vm2932_vm0, %v2933_v1  ;;  %v1946_v37 = vcombine.high %v1945_v34, %v1945_v34  ;;  %v1953_v40 = vrot.slane %v1945_v34, %v3094_v31 }
 0x1f2   :  { %2485 = vmatmul.mubr.msk.f32.vlgmr.msra.gmra.mrb[6].mxu0 %vm71_vm1, %v390_v63 }
 0x1f3   :  { %2724 = vmatpush3.bf16.msra.mxu0 %v3006_v14  ;;  %2506 = vmatprep.mubr.msk.f32.mxu0 %vm2932_vm0, %v2933_v1  ;;  %v1960_v44 = vrot.slane %v1946_v37, %v3094_v31 }
 0x1f4   :  { %2721 = vmatpush3.bf16.msra.mxu1 %v2988_v9  ;;  %2725 = vmatprep.subr.bf16.mxu0 %v2931_v0 }
 0x1f5   :  { %2728 = vmatprep.subr.bf16.mxu1 %v2931_v0 }
 0x1f7   :  { %2727 = vmatpush3.bf16.msra.mxu0 %v3010_v17 }
 0x1f8   :  { %2734 = vmatprep.subr.bf16.mxu0 %v2931_v0 }
 0x2bd   :  { %v459_v3 = vpop.f32.mrb[4].mxu0 }
 0x2be   :  { %v464_v4 = vrot.slane %v459_v3, 6  ;;  %v465_v5 = vrot.slane %v459_v3, 7  ;;  %v2464_v7 = vpop.f32.mrb[5].mxu0 }
 0x2c0   :  { %v468_v8 = vadd.f32 %v464_v4, %v3036_v30  ;;  %v469_v10 = vadd.f32 %v465_v5, %v3038_v32 }
 0x2c2   :  { %2842 = vtanh.f32 %v468_v8  ;;  %v541_v11 = vpop.f32.mrb[4].mxu1 }
 0x2c3   :  { %2844 = vtanh.f32 %v469_v10  ;;  %v2475_v12 = vpop.f32.mrb[5].mxu1 }
 0x2c5   :  { %v611_v13 = vpop.f32.mrb[6].mxu0 }
 0x2c6   :  { %v612_v15 = vadd.f32 %v611_v13, %v541_v11  ;;  %v2486_v16 = vpop.f32.mrb[7].mxu0 }
 0x2c8   :  { %v615_v24 = vadd.f32 %v612_v15, %v3065_v55 }
 0x2ca   :  { %2846 = vtanh.f32 %v615_v24 }
 0x2cc   :  { %v2843_v26 = vpop.eup %2842 }
 0x2cd   :  { %v2845_v27 = vpop.eup %2844  ;;  %v619_v28 = vrot.slane %v2843_v26, 2 }
 0x2ce   :  { %v620_v29 = vrot.slane %v2845_v27, 1 }
 0x2d0   :  { %v621_v33 = vsel %vm156_vm2, %v620_v29, %v619_v28 }
 0x2d1   :  { %2496 = vmatmul.mubr.msk.f32.vlgmr.msra.gmra.mrb[6].mxu1 %vm71_vm1, %v621_v33 }
 0x2d2   :  { %2730 = vmatpush3.bf16.msra.mxu1 %v3042_v41  ;;  %2517 = vmatprep.mubr.msk.f32.mxu1 %vm2932_vm0, %v2933_v1 }
 0x2d3   :  { %2731 = vmatprep.subr.bf16.mxu1 %v2931_v0 }
 0x2d4   :  { %v2847_v35 = vpop.eup %2846 }
 0x2d5   :  { %v1969_v36 = vrot.slane %v2847_v35, %v3094_v31  ;;  %2507 = vmatmul.mubr.msk.f32.vlgmr.msra.gmra.mrb[8].mxu0 %vm71_vm1, %v2847_v35 }
 0x2d6   :  { %2733 = vmatpush3.bf16.msra.mxu1 %v3047_v46  ;;  %2736 = vmatpush3.bf16.msra.mxu0 %v2982_v6 }
 0x2d7   :  { %v1970_v38 = vcombine.high %v1969_v36, %v1969_v36  ;;  %v1977_v39 = vrot.slane %v1969_v36, %v3094_v31  ;;  %2737 = vmatprep.subr.bf16.mxu0 %v2931_v0  ;;  %2740 = vmatprep.subr.bf16.mxu1 %v2931_v0 }
 0x2d8   :  { %2528 = vmatprep.mubr.msk.f32.mxu0 %vm2932_vm0, %v2933_v1 }
 0x2d9   :  { %v1984_v42 = vrot.slane %v1970_v38, %v3094_v31  ;;  %v2120_v43 = vrot.slane %v1977_v39, %v3028_v22  ;;  %2518 = vmatmul.mubr.msk.f32.vlgmr.msra.gmra.mrb[8].mxu1 %vm71_vm1, %v621_v33 }
 0x2da   :  { %2739 = vmatpush3.bf16.msra.mxu0 %v2988_v9  ;;  %2742 = vmatpush3.bf16.msra.mxu1 %v3006_v14 }
 0x2db   :  { %v2124_v45 = vrot.slane %v1984_v42, %v3028_v22  ;;  %2746 = vmatprep.subr.bf16.mxu0 %v2931_v0  ;;  %2743 = vmatprep.subr.bf16.mxu1 %v2931_v0  ;;  %v2188_v47 = vsel %vm2187_vm3, %v1953_v40, %v2120_v43 }
 0x2dc   :  { %2539 = vmatprep.mubr.msk.f32.mxu1 %vm2932_vm0, %v2933_v1 }
 0x2dd   :  { %v2189_v48 = vsel %vm2187_vm3, %v1960_v44, %v2124_v45 }
 0x2de   :  { %2745 = vmatpush3.bf16.msra.mxu1 %v3010_v17 }
 0x2df   :  { %2752 = vmatprep.subr.bf16.mxu1 %v2931_v0 }
 0x3a4   :  { %v690_v49 = vpop.f32.mrb[6].mxu1 }
 0x3a5   :  { %v695_v50 = vrot.slane %v690_v49, 5  ;;  %v696_v51 = vrot.slane %v690_v49, 6  ;;  %v2497_v52 = vpop.f32.mrb[7].mxu1 }
 0x3a7   :  { %v699_v53 = vadd.f32 %v695_v50, %v3036_v30  ;;  %v700_v54 = vadd.f32 %v696_v51, %v3038_v32 }
 0x3a8   :  { %v772_v56 = vpop.f32.mrb[8].mxu0 }
 0x3a9   :  { %2848 = vtanh.f32 %v699_v53  ;;  %v2508_v57 = vpop.f32.mrb[9].mxu0 }
 0x3aa   :  { %2850 = vtanh.f32 %v700_v54 }
 0x3ac   :  { %v842_v58 = vpop.f32.mrb[8].mxu1 }
 0x3ad   :  { %v843_v59 = vadd.f32 %v842_v58, %v772_v56  ;;  %v2519_v60 = vpop.f32.mrb[9].mxu1 }
 0x3af   :  { %v846_v61 = vadd.f32 %v843_v59, %v3065_v55 }
 0x3b1   :  { %2852 = vtanh.f32 %v846_v61 }
 0x3b3   :  { %v2849_v62 = vpop.eup %2848 }
 0x3b4   :  { %v2851_v63 = vpop.eup %2850  ;;  %v850_v2 = vrot.slane %v2849_v62, 3 }
 0x3b5   :  { %v851_v3 = vrot.slane %v2851_v63, 2 }
 0x3b7   :  { %v852_v4 = vsel %vm156_vm2, %v851_v3, %v850_v2 }
 0x3b8   :  { %2529 = vmatmul.mubr.msk.f32.vlgmr.msra.gmra.mrb[10].mxu0 %vm71_vm1, %v852_v4 }
 0x3b9   :  { %2748 = vmatpush3.bf16.msra.mxu0 %v3042_v41  ;;  %2550 = vmatprep.mubr.msk.f32.mxu0 %vm2932_vm0, %v2933_v1 }
 0x3ba   :  { %2749 = vmatprep.subr.bf16.mxu0 %v2931_v0 }
 0x3bb   :  { %v2853_v5 = vpop.eup %2852 }
 0x3bc   :  { %v1991_v7 = vrot.slane %v2853_v5, %v3094_v31  ;;  %2540 = vmatmul.mubr.msk.f32.vlgmr.msra.gmra.mrb[10].mxu1 %vm71_vm1, %v2853_v5 }
 0x3bd   :  { %2751 = vmatpush3.bf16.msra.mxu0 %v3047_v46  ;;  %2754 = vmatpush3.bf16.msra.mxu1 %v2982_v6 }
 0x3be   :  { %v1992_v8 = vcombine.high %v1991_v7, %v1991_v7  ;;  %v1999_v10 = vrot.slane %v1991_v7, %v3094_v31  ;;  %2755 = vmatprep.subr.bf16.mxu1 %v2931_v0  ;;  %2758 = vmatprep.subr.bf16.mxu0 %v2931_v0 }
 0x3bf   :  { %2561 = vmatprep.mubr.msk.f32.mxu1 %vm2932_vm0, %v2933_v1 }
 0x3c0   :  { %v2006_v11 = vrot.slane %v1992_v8, %v3094_v31  ;;  %v2130_v12 = vrot.slane %v1999_v10, %v3028_v22  ;;  %2551 = vmatmul.mubr.msk.f32.vlgmr.msra.gmra.mrb[12].mxu0 %vm71_vm1, %v852_v4 }
 0x3c1   :  { %2757 = vmatpush3.bf16.msra.mxu1 %v2988_v9  ;;  %2760 = vmatpush3.bf16.msra.mxu0 %v3006_v14 }
 0x3c2   :  { %2764 = vmatprep.subr.bf16.mxu1 %v2931_v0  ;;  %2761 = vmatprep.subr.bf16.mxu0 %v2931_v0  ;;  %v2191_v13 = vsel %vm2190_vm4, %v2188_v47, %v2130_v12  ;;  %v2134_v15 = vrot.slane %v2006_v11, %v3028_v22 }
 0x3c3   :  { %2572 = vmatprep.mubr.msk.f32.mxu0 %vm2932_vm0, %v2933_v1 }
 0x3c4   :  { %v2192_v16 = vsel %vm2190_vm4, %v2189_v48, %v2134_v15 }
 0x3c5   :  { %2763 = vmatpush3.bf16.msra.mxu0 %v3010_v17 }
 0x3c6   :  { %2770 = vmatprep.subr.bf16.mxu0 %v2931_v0 }
 0x48b   :  { %v921_v18 = vpop.f32.mrb[10].mxu0 }
 0x48c   :  { %v926_v21 = vrot.slane %v921_v18, 4  ;;  %v927_v24 = vrot.slane %v921_v18, 5  ;;  %v2530_v25 = vpop.f32.mrb[11].mxu0 }
 0x48e   :  { %v930_v26 = vadd.f32 %v926_v21, %v3036_v30  ;;  %v931_v27 = vadd.f32 %v927_v24, %v3038_v32 }
 0x48f   :  { %v1003_v28 = vpop.f32.mrb[10].mxu1 }
 0x490   :  { %2854 = vtanh.f32 %v930_v26  ;;  %v2541_v29 = vpop.f32.mrb[11].mxu1 }
 0x491   :  { %2856 = vtanh.f32 %v931_v27 }
 0x493   :  { %v1073_v33 = vpop.f32.mrb[12].mxu0 }
 0x494   :  { %v1074_v34 = vadd.f32 %v1073_v33, %v1003_v28  ;;  %v2552_v35 = vpop.f32.mrb[13].mxu0 }
 0x496   :  { %v1077_v36 = vadd.f32 %v1074_v34, %v3065_v55 }
 0x498   :  { %2858 = vtanh.f32 %v1077_v36 }
 0x49a   :  { %v2855_v37 = vpop.eup %2854 }
 0x49b   :  { %v2857_v38 = vpop.eup %2856  ;;  %v1081_v39 = vrot.slane %v2855_v37, 4 }
 0x49c   :  { %v1082_v40 = vrot.slane %v2857_v38, 3 }
 0x49e   :  { %v1083_v42 = vsel %vm156_vm2, %v1082_v40, %v1081_v39 }
 0x49f   :  { %2562 = vmatmul.mubr.msk.f32.vlgmr.msra.gmra.mrb[12].mxu1 %vm71_vm1, %v1083_v42 }
 0x4a0   :  { %2766 = vmatpush3.bf16.msra.mxu1 %v3042_v41  ;;  %2583 = vmatprep.mubr.msk.f32.mxu1 %vm2932_vm0, %v2933_v1 }
 0x4a1   :  { %2767 = vmatprep.subr.bf16.mxu1 %v2931_v0 }
 0x4a2   :  { %v2859_v43 = vpop.eup %2858 }
 0x4a3   :  { %v2013_v44 = vrot.slane %v2859_v43, %v3094_v31  ;;  %2573 = vmatmul.mubr.msk.f32.vlgmr.msra.gmra.mrb[14].mxu0 %vm71_vm1, %v2859_v43 }
 0x4a4   :  { %2769 = vmatpush3.bf16.msra.mxu1 %v3047_v46  ;;  %2772 = vmatpush3.bf16.msra.mxu0 %v2982_v6 }
 0x4a5   :  { %v2014_v45 = vcombine.high %v2013_v44, %v2013_v44  ;;  %v2021_v47 = vrot.slane %v2013_v44, %v3094_v31  ;;  %2773 = vmatprep.subr.bf16.mxu0 %v2931_v0  ;;  %2776 = vmatprep.subr.bf16.mxu1 %v2931_v0 }
 0x4a6   :  { %2594 = vmatprep.mubr.msk.f32.mxu0 %vm2932_vm0, %v2933_v1 }
 0x4a7   :  { %v2028_v48 = vrot.slane %v2014_v45, %v3094_v31  ;;  %2584 = vmatmul.mubr.msk.f32.vlgmr.msra.gmra.mrb[14].mxu1 %vm71_vm1, %v1083_v42  ;;  %v2140_v49 = vrot.slane %v2021_v47, %v3028_v22 }
 0x4a8   :  { %2775 = vmatpush3.bf16.msra.mxu0 %v2988_v9  ;;  %2778 = vmatpush3.bf16.msra.mxu1 %v3006_v14 }
 0x4a9   :  { %2782 = vmatprep.subr.bf16.mxu0 %v2931_v0  ;;  %2779 = vmatprep.subr.bf16.mxu1 %v2931_v0  ;;  %v2194_v50 = vsel %vm2193_vm5, %v2191_v13, %v2140_v49  ;;  %v2144_v51 = vrot.slane %v2028_v48, %v3028_v22 }
 0x4aa   :  { %2605 = vmatprep.mubr.msk.f32.mxu1 %vm2932_vm0, %v2933_v1 }
 0x4ab   :  { %v2195_v52 = vsel %vm2193_vm5, %v2192_v16, %v2144_v51 }
 0x4ac   :  { %2781 = vmatpush3.bf16.msra.mxu1 %v3010_v17 }
 0x4ad   :  { %2788 = vmatprep.subr.bf16.mxu1 %v2931_v0 }
 0x572   :  { %v1152_v53 = vpop.f32.mrb[12].mxu1 }
 0x573   :  { %v1157_v54 = vrot.slane %v1152_v53, 3  ;;  %v1158_v56 = vrot.slane %v1152_v53, 4  ;;  %v2563_v57 = vpop.f32.mrb[13].mxu1 }
 0x575   :  { %v1161_v58 = vadd.f32 %v1157_v54, %v3036_v30  ;;  %v1162_v59 = vadd.f32 %v1158_v56, %v3038_v32 }
 0x576   :  { %v1234_v60 = vpop.f32.mrb[14].mxu0 }
 0x577   :  { %2860 = vtanh.f32 %v1161_v58  ;;  %v2574_v61 = vpop.f32.mrb[15].mxu0 }
 0x578   :  { %2862 = vtanh.f32 %v1162_v59 }
 0x57a   :  { %v1304_v62 = vpop.f32.mrb[14].mxu1 }
 0x57b   :  { %v1305_v63 = vadd.f32 %v1304_v62, %v1234_v60  ;;  %v2585_v2 = vpop.f32.mrb[15].mxu1 }
 0x57d   :  { %v1308_v3 = vadd.f32 %v1305_v63, %v3065_v55 }
 0x57f   :  { %2864 = vtanh.f32 %v1308_v3 }
 0x581   :  { %v2861_v4 = vpop.eup %2860 }
 0x582   :  { %v2863_v5 = vpop.eup %2862  ;;  %v1312_v7 = vrot.slane %v2861_v4, 5 }
 0x583   :  { %v1313_v8 = vrot.slane %v2863_v5, 4 }
 0x585   :  { %v1314_v10 = vsel %vm156_vm2, %v1313_v8, %v1312_v7 }
 0x586   :  { %2595 = vmatmul.mubr.msk.f32.vlgmr.msra.gmra.mrb[16].mxu0 %vm71_vm1, %v1314_v10 }
 0x587   :  { %2784 = vmatpush3.bf16.msra.mxu0 %v3042_v41  ;;  %2616 = vmatprep.mubr.msk.f32.mxu0 %vm2932_vm0, %v2933_v1 }
 0x588   :  { %2785 = vmatprep.subr.bf16.mxu0 %v2931_v0 }
 0x589   :  { %v2865_v11 = vpop.eup %2864 }
 0x58a   :  { %v2035_v12 = vrot.slane %v2865_v11, %v3094_v31  ;;  %2606 = vmatmul.mubr.msk.f32.vlgmr.msra.gmra.mrb[16].mxu1 %vm71_vm1, %v2865_v11 }
 0x58b   :  { %2787 = vmatpush3.bf16.msra.mxu0 %v3047_v46  ;;  %2790 = vmatpush3.bf16.msra.mxu1 %v2982_v6 }
 0x58c   :  { %v2036_v13 = vcombine.high %v2035_v12, %v2035_v12  ;;  %2791 = vmatprep.subr.bf16.mxu1 %v2931_v0  ;;  %2794 = vmatprep.subr.bf16.mxu0 %v2931_v0  ;;  %v2043_v15 = vrot.slane %v2035_v12, %v3094_v31 }
 0x58d   :  { %2627 = vmatprep.mubr.msk.f32.mxu1 %vm2932_vm0, %v2933_v1 }
 0x58e   :  { %2617 = vmatmul.mubr.msk.f32.vlgmr.msra.gmra.mrb[18].mxu0 %vm71_vm1, %v1314_v10  ;;  %v2150_v16 = vrot.slane %v2043_v15, %v3028_v22  ;;  %v2050_v18 = vrot.slane %v2036_v13, %v3094_v31 }
 0x58f   :  { %2793 = vmatpush3.bf16.msra.mxu1 %v2988_v9  ;;  %2796 = vmatpush3.bf16.msra.mxu0 %v3006_v14 }
 0x590   :  { %2800 = vmatprep.subr.bf16.mxu1 %v2931_v0  ;;  %2797 = vmatprep.subr.bf16.mxu0 %v2931_v0  ;;  %v2197_v6 = vsel %vm2196_vm6, %v2194_v50, %v2150_v16  ;;  %v2154_v21 = vrot.slane %v2050_v18, %v3028_v22  ;;  %v2221_v16 = vrot.slane %v3030_v23, 4 }
 0x591   :  { %2638 = vmatprep.mubr.msk.f32.mxu0 %vm2932_vm0, %v2933_v1 }
 0x592   :  { %v2198_v24 = vsel %vm2196_vm6, %v2195_v52, %v2154_v21  ;;  %2818 = vpush %v2221_v16 }
 0x593   :  { %2799 = vmatpush3.bf16.msra.mxu0 %v3010_v17 }
 0x594   :  { %2806 = vmatprep.subr.bf16.mxu0 %v2931_v0 }
 0x659   :  { %v1383_v25 = vpop.f32.mrb[16].mxu0 }
 0x65a   :  { %v1388_v26 = vrot.slane %v1383_v25, 2  ;;  %v1389_v9 = vrot.slane %v1383_v25, 3  ;;  %v2596_v27 = vpop.f32.mrb[17].mxu0 }
 0x65b   :  { %v2210_v27 = vsub.s32 3, %v3025_v20 }
 0x65c   :  { %v1392_v28 = vadd.f32 %v1388_v26, %v3036_v30  ;;  %v1393_v29 = vadd.f32 %v1389_v9, %v3038_v32 }
 0x65d   :  { %v1465_v33 = vpop.f32.mrb[16].mxu1 }
 0x65e   :  { %2866 = vtanh.f32 %v1392_v28  ;;  %v2607_v34 = vpop.f32.mrb[17].mxu1 }
 0x65f   :  { %2868 = vtanh.f32 %v1393_v29 }
 0x661   :  { %v1535_v35 = vpop.f32.mrb[18].mxu0 }
 0x662   :  { %v1536_v36 = vadd.f32 %v1535_v35, %v1465_v33  ;;  %v2618_v37 = vpop.f32.mrb[19].mxu0 }
 0x664   :  { %v1539_v38 = vadd.f32 %v1536_v36, %v3065_v55  ;;  %v2211_v36 = vrot.slane %v3030_v23, %v2210_v27 }
 0x666   :  { %2870 = vtanh.f32 %v1539_v38 }
 0x668   :  { %v2867_v39 = vpop.eup %2866 }
 0x669   :  { %v2869_v40 = vpop.eup %2868  ;;  %v1543_v42 = vrot.slane %v2867_v39, 6 }
 0x66a   :  { %v1544_v43 = vrot.slane %v2869_v40, 5 }
 0x66c   :  { %v1545_v44 = vsel %vm156_vm2, %v1544_v43, %v1543_v42 }
 0x66d   :  { %2628 = vmatmul.mubr.msk.f32.vlgmr.msra.gmra.mrb[18].mxu1 %vm71_vm1, %v1545_v44 }
 0x66e   :  { %2802 = vmatpush3.bf16.msra.mxu1 %v3042_v41  ;;  %2649 = vmatprep.mubr.msk.f32.mxu1 %vm2932_vm0, %v2933_v1 }
 0x66f   :  { %2803 = vmatprep.subr.bf16.mxu1 %v2931_v0 }
 0x670   :  { %v2871_v45 = vpop.eup %2870 }
 0x671   :  { %v2057_v47 = vrot.slane %v2871_v45, %v3094_v31  ;;  %2639 = vmatmul.mubr.msk.f32.vlgmr.msra.gmra.mrb[20].mxu0 %vm71_vm1, %v2871_v45 }
 0x672   :  { %2805 = vmatpush3.bf16.msra.mxu1 %v3047_v46  ;;  %2808 = vmatpush3.bf16.msra.mxu0 %v3006_v14 }
 0x673   :  { %v2058_v48 = vcombine.high %v2057_v47, %v2057_v47  ;;  %2812 = vmatprep.subr.bf16.mxu1 %v2931_v0  ;;  %2809 = vmatprep.subr.bf16.mxu0 %v2931_v0  ;;  %v2065_v49 = vrot.slane %v2057_v47, %v3094_v31 }
 0x674   :  { %2660 = vmatprep.mubr.msk.f32.mxu0 %vm2932_vm0, %v2933_v1 }
 0x675   :  { %2650 = vmatmul.mubr.msk.f32.vlgmr.msra.gmra.mrb[20].mxu1 %vm71_vm1, %v1545_v44  ;;  %v2160_v50 = vrot.slane %v2065_v49, %v3028_v22  ;;  %v2072_v51 = vrot.slane %v2058_v48, %v3094_v31 }
 0x676   :  { %2814 = vmatpush3.bf16.msra.mxu1 %v3042_v41  ;;  %2671 = vmatprep.mubr.msk.f32.mxu1 %vm2932_vm0, %v2933_v1 }
 0x677   :  { %2815 = vmatprep.subr.bf16.mxu1 %v2931_v0  ;;  %2811 = vmatpush3.bf16.msra.mxu0 %v3010_v17  ;;  %v2200_v14 = vsel %vm2199_vm7, %v2197_v6, %v2160_v50  ;;  %v2164_v52 = vrot.slane %v2072_v51, %v3028_v22 }
 0x679   :  { %v2201_v53 = vsel %vm2199_vm7, %v2198_v24, %v2164_v52 }
 0x67a   :  { %2817 = vmatpush3.bf16.msra.mxu1 %v3047_v46 }
 0x740   :  { %v1614_v54 = vpop.f32.mrb[18].mxu1 }
 0x741   :  { %v1619_v56 = vrot.slane %v1614_v54, 1  ;;  %v1620_v57 = vrot.slane %v1614_v54, 2  ;;  %v2629_v58 = vpop.f32.mrb[19].mxu1 }
 0x743   :  { %v1623_v59 = vadd.f32 %v1619_v56, %v3036_v30  ;;  %v1624_v41 = vadd.f32 %v1620_v57, %v3038_v32 }
 0x744   :  { %v1696_v60 = vpop.f32.mrb[20].mxu0 }
 0x745   :  { %2872 = vtanh.f32 %v1623_v59  ;;  %v2640_v1 = vpop.f32.mrb[21].mxu0 }
 0x746   :  { %2874 = vtanh.f32 %v1624_v41 }
 0x748   :  { %v1766_v0 = vpop.f32.mrb[20].mxu1 }
 0x749   :  { %v1767_v17 = vadd.f32 %v1766_v0, %v1696_v60  ;;  %v2651_v61 = vpop.f32.mrb[21].mxu1 }
 0x74b   :  { %v1770_v62 = vadd.f32 %v1767_v17, %v3065_v55 }
 0x74d   :  { %2876 = vtanh.f32 %v1770_v62 }
 0x74f   :  { %v2873_v46 = vpop.eup %2872 }
 0x750   :  { %v2875_v63 = vpop.eup %2874  ;;  %v1847_v2 = vrot.slane %v2873_v46, 7  ;;  %1934 = vst.msk [vmem:[#allocation5 - $0x7] sm:$0x80] %vm1933_vm8, %v2873_v46 }
 0x751   :  { %v1927_v30 = vrot.slane %v2875_v63, 7  ;;  %v1848_v3 = vrot.slane %v2875_v63, 6 }
 0x753   :  { %v1849_v32 = vsel %vm156_vm2, %v1848_v3, %v1847_v2  ;;  %1936 = vst.msk [vmem:[#allocation5 + $0x1] sm:$0x1] %vm1935_vm9, %v1927_v30 }
 0x754   :  { %2672 = vmatmul.mubr.msk.f32.vlgmr.msra.gmra.mrb[22].mxu1 %vm71_vm1, %v1849_v32 }
 0x757   :  { %v2877_v4 = vpop.eup %2876 }
 0x758   :  { %2661 = vmatmul.mubr.msk.f32.vlgmr.msra.gmra.mrb[22].mxu0 %vm71_vm1, %v2877_v4  ;;  %v2079_v5 = vrot.slane %v2877_v4, %v3094_v31 }
 0x75a   :  { %v2087_v7 = vrot.slane %v2079_v5, %v3094_v31  ;;  %v2080_v8 = vcombine.high %v2079_v5, %v2079_v5 }
 0x75c   :  { %v2170_v10 = vrot.slane %v2087_v7, %v3028_v22  ;;  %v2094_v11 = vrot.slane %v2080_v8, %v3094_v31 }
 0x75e   :  { %v2203_v12 = vsel %vm2202_vm10, %v2200_v14, %v2170_v10  ;;  %v2174_v13 = vrot.slane %v2094_v11, %v3028_v22 }
 0x760   :  { %v2204_v15 = vsel %vm2202_vm10, %v2201_v53, %v2174_v13 }
 0x827   :  { %v1918_v18 = vpop.f32.mrb[22].mxu1 }
 0x828   :  { %v2673_v6 = vpop.f32.mrb[23].mxu1 }
 0x82b   :  { %v1841_v21 = vpop.f32.mrb[22].mxu0 }
 0x82c   :  { %v1919_v24 = vadd.f32 %v1918_v18, %v1841_v21  ;;  %v2662_v25 = vpop.f32.mrb[23].mxu0 }
 0x82e   :  { %v1922_v26 = vadd.f32 %v1919_v24, %v3065_v55 }
 0x830   :  { %2878 = vtanh.f32 %v1922_v26 }
 0x83a   :  { %v2879_v9 = vpop.eup %2878 }
 0x83b   :  { %v2101_v28 = vrot.slane %v2879_v9, %v3094_v31  ;;  %v1925_v29 = vrot.slane %v2879_v9, 1  ;;  %v2289_v33 = vrot.slane %v2879_v9, 9 }
 0x83d   :  { %v2109_v34 = vrot.slane %v2101_v28, %v3094_v31  ;;  %v2102_v35 = vcombine.high %v2101_v28, %v2101_v28  ;;  %1937 = vst.msk [vmem:[#allocation5 - $0x5] sm:$0x80] %vm1933_vm8, %v1925_v29 }
 0x83e   :  { %1938 = vst.msk [vmem:[#allocation5 + $0x3] sm:$0x1] %vm1935_vm9, %v2289_v33 }
 0x83f   :  { %v2180_v55 = vrot.slane %v2109_v34, %v3028_v22  ;;  %v2116_v37 = vrot.slane %v2102_v35, %v3094_v31 }
 0x841   :  { %v2206_v38 = vsel %vm2205_vm11, %v2203_v12, %v2180_v55  ;;  %v2184_v39 = vrot.slane %v2116_v37, %v3028_v22 }
 0x842   :  { %v2212_v40 = vmul.f32 %v2211_v36, %v2206_v38 }
 0x843   :  { %v2207_v42 = vsel %vm2205_vm11, %v2204_v15, %v2184_v39 }
 0x844   :  { %v2214_v43 = vsel %vm71_vm1, %v2212_v40, 0.0  ;;  %v2213_v44 = vmul.f32 %v2211_v36, %v2207_v42 }
 0x845   :  { %2215 = vadd.xlane.f32.xlu1 %v2214_v43 }
 0x846   :  { %v2217_v45 = vsel %vm71_vm1, %v2213_v44, 0.0 }
 0x849   :  { %2218 = vadd.xlane.f32.xlu1 %v2217_v45 }
 0x84a   :  { %2913 = shalt.err (!%p2910_p12)
}
 0x84b   :  { %s2914_s13 = scalar_lea.hbm %s3292_s4, 64 }
 0x84c   :  { %p2915_p13 = scmp.ne.s32.totalorder %s3292_s4, %s2914_s13  ;;  %p2918_p0 = scmp.lt.u32.totalorder %s2914_s13, %s3292_s4 }
 0x84e   :  { %p2920_p1 = pnand %p2918_p0, %p2915_p13 }
 0x850   :  { %2923 = shalt.err (!%p2920_p1)
}
 0x851   :  { %s2937_s18 = smov 32   ;;  %s2938_s19 = smov 2   ;;  %v2230_v22 = vand.u32 127, %v56_v19  ;;  %vm2241_vm12 = vcmask 58368  }
 0x852   :  { %2256 = dma.vmem_to_hbm [thread:$0]  %s2251_s9, 64, %s3292_s4, [#allocation4], %s2937_s18, %s2937_s18, %s2938_s19  }
 0x853   :  { %s2819_s22 = spop %2818  ;;  %v2233_v47 = vsub.s32 %v2230_v22, %v3025_v20 }
 0x854   :  { %v2223_v23 = vstv %s2819_s22 }
 0x8d2   :  { %v2216_v31 = vpop.xlane.xlu1 %2215 }
 0x8d3   :  { %v2225_v48 = vadd.f32 %v2223_v23, %v2216_v31 }
 0x8d5   :  { %v2234_v51 = vrot.slane %v2225_v48, %v2233_v47 }
 0x8d6   :  { %v2219_v49 = vpop.xlane.xlu1 %2218 }
 0x8d7   :  { %v2226_v50 = vadd.f32 %v2223_v23, %v2219_v49 }
 0x8d9   :  { %v2238_v14 = vrot.slane %v2226_v50, %v2233_v47 }
 0x8db   :  { %v2239_v52 = vsel %vm156_vm2, %v2238_v14, %v2234_v51 }
 0x8dc   :  { %2242 = vst.msk [vmem:[%s3291_s3] sm:$0x3] %vm2241_vm12, %v2239_v52 }
 0x8dd   :  { %2926 = dma.done.wait [#allocation4], 64  }
 0x8de   :  { %2927 = vsyncadd [#allocation4], 4294967232 }
 0x8df   :  { %2262 = vsyncpa [#allocation3], 1 }
 0x8e0   :  { %2263 = vsyncpa [#allocation4], 1 }

</bundles_post_ra>
